<compile_context>
chip_gen: v7x
topology: tpu7x:2x2x1
jax: 0.10.0
libtpu: 0.0.40
codegen_flags: <defaults>
</compile_context>

<pallas_src>
import jax
import jax.numpy as jnp
from jax.experimental import pallas as pl
from jax.experimental.pallas import tpu as pltpu


def _round_up(a: int, b: int) -> int:
    return ((a + b - 1) // b) * b


def _myblock_kernel(w_ref, b_ref, x_ref, o_ref):
    # w_ref: SMEM [Din*Dout] fused weight, row-major (w[k*Dout + n] = W_fused[k, n])
    # b_ref: SMEM [Dout]     fused bias
    # x_ref: VMEM [Din, TM]  lane-dense activations (M on the lane axis)
    # o_ref: VMEM [Dout, TM] lane-dense output
    din = x_ref.shape[0]
    dout = o_ref.shape[0]

    x = x_ref[...].astype(jnp.float32)          # (Din, TM)

    rows = []
    for n in range(dout):                       # unrolled: Dout = 2
        acc = x[0:1, :] * w_ref[n]              # scalar from SMEM broadcast over lanes
        for k in range(1, din):                 # unrolled: Din = 4
            acc = acc + x[k:k + 1, :] * w_ref[k * dout + n]
        rows.append(acc + b_ref[n])             # (1, TM)

    o_ref[...] = jnp.concatenate(rows, axis=0).astype(o_ref.dtype)


def myblock_forward(x, wq, bq, wo, bo, *, tile_m: int = 2048):
    """x: [B, S, 4] float32.
    wq: [4, 4] (PyTorch layout [out, in]), bq: [4],
    wo: [2, 4] ([out, in]),                bo: [2].
    Returns [B, S, 2]."""
    B, S, Din = x.shape
    Dout = wo.shape[0]
    M = B * S

    # --- algebraic fusion of the two affine layers (exact up to fp reorder) ---
    #   z = (x @ Wq^T + bq) @ Wo^T + bo  =  x @ (Wq^T @ Wo^T) + (bq @ Wo^T + bo)
    w_fused = (wq.T @ wo.T).astype(jnp.float32)        # [Din, Dout] = [4, 2]
    b_fused = (bq @ wo.T + bo).astype(jnp.float32)     # [Dout] = [2]
    w_flat = w_fused.reshape(-1)                       # [Din*Dout], row-major

    # --- lane-dense layout: put M on the lane (last) axis ---
    x_t = x.reshape(M, Din).T                          # [Din, M]

    # --- tile M; lane dim of each block must be a multiple of 128 ---
    tm = min(_round_up(tile_m, 128), _round_up(M, 128))
    m_pad = _round_up(M, tm)
    if m_pad != M:
        x_t = jnp.pad(x_t, ((0, 0), (0, m_pad - M)))   # zero-pad; sliced off below

    grid = (m_pad // tm,)

    out_t = pl.pallas_call(
        _myblock_kernel,
        out_shape=jax.ShapeDtypeStruct((Dout, m_pad), x.dtype),
        grid_spec=pltpu.PrefetchScalarGridSpec(
            # Fused weight + bias are scalar-prefetched into SMEM.
            num_scalar_prefetch=2,
            grid=grid,
            in_specs=[
                pl.BlockSpec((Din, tm), lambda i, w_s, b_s: (0, i)),
            ],
            out_specs=pl.BlockSpec((Dout, tm), lambda i, w_s, b_s: (0, i)),
        ),
        compiler_params=pltpu.CompilerParams(
            # Independent M-tiles -> shardable across v7x's two TensorCores.
            dimension_semantics=("parallel",),
        ),
    )(w_flat, b_fused, x_t)

    out2d = out_t[:, :M].T                             # [M, Dout]
    return out2d.reshape(B, S, Dout)


if __name__ == "__main__":
    key = jax.random.PRNGKey(0)
    kx, kwq, kbq, kwo, kbo = jax.random.split(key, 5)

    # Small shapes consistent with the module: 4 input features, 2 output features.
    B, S, D = 2, 8, 4
    x = jax.random.normal(kx, (B, S, D), dtype=jnp.float32)

    # PyTorch layout: weight = [out_features, in_features].
    wq = jax.random.normal(kwq, (4, 4), dtype=jnp.float32) * 0.5   # q_proj.weight
    bq = jax.random.normal(kbq, (4,), dtype=jnp.float32) * 0.1     # q_proj.bias
    wo = jax.random.normal(kwo, (2, 4), dtype=jnp.float32) * 0.5   # out_proj.weight
    bo = jax.random.normal(kbo, (2,), dtype=jnp.float32) * 0.1     # out_proj.bias

    z = myblock_forward(x, wq, bq, wo, bo)
    z = jax.block_until_ready(z)

    # Pure-JAX reference of the original (unfused) two-layer forward.
    ref = (x @ wq.T + bq) @ wo.T + bo
    assert z.shape == (B, S, 2)
    assert jnp.allclose(z, ref, atol=1e-5, rtol=1e-5)

    print("KERNEL_OK")
</pallas_src>

<mosaic_0001>
module attributes {stable_mosaic.version = 11 : i64} {
  func.func @_myblock_kernel(%arg0: i32, %arg1: memref<8xf32, #tpu.memory_space<smem>>, %arg2: memref<2xf32, #tpu.memory_space<smem>>, %arg3: memref<4x128xf32, #tpu.memory_space<vmem>>, %arg4: memref<2x128xf32, #tpu.memory_space<vmem>>) attributes {dimension_semantics = [#tpu.dimension_semantics<parallel>], iteration_bounds = array<i64: 1>, scalar_prefetch = 2 : i64, scratch_operands = 0 : i64, tpu.core_type = #tpu.core_type<tc>, window_params = [{transform_indices = @transform_0, window_bounds = array<i64: 4, 128>}, {transform_indices = @transform_1, window_bounds = array<i64: 2, 128>}]} {
    %c0 = arith.constant 0 : index
    %c0_0 = arith.constant 0 : index
    %0 = vector.load %arg3[%c0, %c0_0] : memref<4x128xf32, #tpu.memory_space<vmem>>, vector<4x128xf32>
    %1 = vector.extract_strided_slice %0 {offsets = [0, 0], sizes = [1, 128], strides = [1, 1]} : vector<4x128xf32> to vector<1x128xf32>
    %c0_1 = arith.constant 0 : index
    %2 = memref.load %arg1[%c0_1] : memref<8xf32, #tpu.memory_space<smem>>
    %3 = vector.broadcast %2 : f32 to vector<1x128xf32>
    %4 = arith.mulf %1, %3 : vector<1x128xf32>
    %5 = vector.extract_strided_slice %0 {offsets = [1, 0], sizes = [1, 128], strides = [1, 1]} : vector<4x128xf32> to vector<1x128xf32>
    %c2 = arith.constant 2 : index
    %6 = memref.load %arg1[%c2] : memref<8xf32, #tpu.memory_space<smem>>
    %7 = vector.broadcast %6 : f32 to vector<1x128xf32>
    %8 = arith.mulf %5, %7 : vector<1x128xf32>
    %9 = arith.addf %4, %8 : vector<1x128xf32>
    %10 = vector.extract_strided_slice %0 {offsets = [2, 0], sizes = [1, 128], strides = [1, 1]} : vector<4x128xf32> to vector<1x128xf32>
    %c4 = arith.constant 4 : index
    %11 = memref.load %arg1[%c4] : memref<8xf32, #tpu.memory_space<smem>>
    %12 = vector.broadcast %11 : f32 to vector<1x128xf32>
    %13 = arith.mulf %10, %12 : vector<1x128xf32>
    %14 = arith.addf %9, %13 : vector<1x128xf32>
    %15 = vector.extract_strided_slice %0 {offsets = [3, 0], sizes = [1, 128], strides = [1, 1]} : vector<4x128xf32> to vector<1x128xf32>
    %c6 = arith.constant 6 : index
    %16 = memref.load %arg1[%c6] : memref<8xf32, #tpu.memory_space<smem>>
    %17 = vector.broadcast %16 : f32 to vector<1x128xf32>
    %18 = arith.mulf %15, %17 : vector<1x128xf32>
    %19 = arith.addf %14, %18 : vector<1x128xf32>
    %c0_2 = arith.constant 0 : index
    %20 = memref.load %arg2[%c0_2] : memref<2xf32, #tpu.memory_space<smem>>
    %21 = vector.broadcast %20 : f32 to vector<1x128xf32>
    %22 = arith.addf %19, %21 : vector<1x128xf32>
    %23 = vector.extract_strided_slice %0 {offsets = [0, 0], sizes = [1, 128], strides = [1, 1]} : vector<4x128xf32> to vector<1x128xf32>
    %c1 = arith.constant 1 : index
    %24 = memref.load %arg1[%c1] : memref<8xf32, #tpu.memory_space<smem>>
    %25 = vector.broadcast %24 : f32 to vector<1x128xf32>
    %26 = arith.mulf %23, %25 : vector<1x128xf32>
    %27 = vector.extract_strided_slice %0 {offsets = [1, 0], sizes = [1, 128], strides = [1, 1]} : vector<4x128xf32> to vector<1x128xf32>
    %c3 = arith.constant 3 : index
    %28 = memref.load %arg1[%c3] : memref<8xf32, #tpu.memory_space<smem>>
    %29 = vector.broadcast %28 : f32 to vector<1x128xf32>
    %30 = arith.mulf %27, %29 : vector<1x128xf32>
    %31 = arith.addf %26, %30 : vector<1x128xf32>
    %32 = vector.extract_strided_slice %0 {offsets = [2, 0], sizes = [1, 128], strides = [1, 1]} : vector<4x128xf32> to vector<1x128xf32>
    %c5 = arith.constant 5 : index
    %33 = memref.load %arg1[%c5] : memref<8xf32, #tpu.memory_space<smem>>
    %34 = vector.broadcast %33 : f32 to vector<1x128xf32>
    %35 = arith.mulf %32, %34 : vector<1x128xf32>
    %36 = arith.addf %31, %35 : vector<1x128xf32>
    %37 = vector.extract_strided_slice %0 {offsets = [3, 0], sizes = [1, 128], strides = [1, 1]} : vector<4x128xf32> to vector<1x128xf32>
    %c7 = arith.constant 7 : index
    %38 = memref.load %arg1[%c7] : memref<8xf32, #tpu.memory_space<smem>>
    %39 = vector.broadcast %38 : f32 to vector<1x128xf32>
    %40 = arith.mulf %37, %39 : vector<1x128xf32>
    %41 = arith.addf %36, %40 : vector<1x128xf32>
    %c1_3 = arith.constant 1 : index
    %42 = memref.load %arg2[%c1_3] : memref<2xf32, #tpu.memory_space<smem>>
    %43 = vector.broadcast %42 : f32 to vector<1x128xf32>
    %44 = arith.addf %41, %43 : vector<1x128xf32>
    %45 = tpu.concatenate %22, %44 in 0 : vector<1x128xf32>, vector<1x128xf32> -> vector<2x128xf32>
    %c0_4 = arith.constant 0 : index
    %c0_5 = arith.constant 0 : index
    %46 = vector.load %arg4[%c0_4, %c0_5] : memref<2x128xf32, #tpu.memory_space<vmem>>, vector<2x128xf32>
    tpu.vector_store %arg4[%c0_4, %c0_5], %45 {strides = array<i32>} : memref<2x128xf32, #tpu.memory_space<vmem>>, vector<2x128xf32>,
    return
  }
  func.func @transform_0(%arg0: i32, %arg1: memref<8xf32, #tpu.memory_space<smem>>, %arg2: memref<2xf32, #tpu.memory_space<smem>>) -> (i32, i32) {
    %c0_i32 = arith.constant 0 : i32
    %c0_i32_0 = arith.constant 0 : i32
    return %c0_i32, %arg0 : i32, i32
  }
  func.func @transform_1(%arg0: i32, %arg1: memref<8xf32, #tpu.memory_space<smem>>, %arg2: memref<2xf32, #tpu.memory_space<smem>>) -> (i32, i32) {
    %c0_i32 = arith.constant 0 : i32
    %c0_i32_0 = arith.constant 0 : i32
    return %c0_i32, %arg0 : i32, i32
  }
}

</mosaic_0001>

<bundles_post_ra>
// kernel: tpu_custom_call.1
= control target key start
LH: loop header
LB: loop body
LE: loop exit
PB: predicated region body
PF: predicated region fallthrough
CT: control target
= control target key end

     0   :  { %s206_s0 = inlined_call_operand.hbm [shape: f32[8], index: 0, kind: input, shape index: {}]   ;;  %s207_s2 = inlined_call_operand.vmem [shape: f32[4,128], index: 2, kind: input, shape index: {}]   ;;  %s208_s3 = inlined_call_operand.hbm [shape: f32[2,128], index: 3, kind: output, shape index: {}]   ;;  %s209_s1 = inlined_call_operand.vmem [shape: f32[2], index: 1, kind: input, shape index: {}]  }
   0x1   :  { %s105_s14 = scalar_lea.hbm %s206_s0, 16 }
   0x2   :  { %p106_p0 = scmp.ne.s32.totalorder %s206_s0, %s105_s14  ;;  %p109_p1 = scmp.lt.u32.totalorder %s105_s14, %s206_s0 }
   0x4   :  { %p111_p2 = pnand %p109_p1, %p106_p0 }
   0x6   :  { %114 = shalt.err (!%p111_p2)  }
   0x7   :  { %s153_s19 = smov [#allocation3]   ;;  %s10_s24 = sshll.u32 %s209_s1, 4  ;;  %s11_s24 = int_to_ptr.vmem [resolvable:$true] %s10_s24 }
   0x8   :  { %9 = dma.hbm_to_smem %s206_s0, 16, %s153_s19, [#allocation2] }
   0x9   :  { %s115_s25 = scalar_lea.vmem %s11_s24, 16  ;;  %p120_p4 = scmp.lt.s32.totalorder %s11_s24, %s11_s24 }
   0xa   :  { %p116_p3 = scmp.ne.s32.totalorder %s11_s24, %s115_s25  ;;  %p121_p5 = scmp.lt.s32.totalorder %s115_s25, %s115_s25 }
   0xc   :  { %p122_p6 = por %p121_p5, %p120_p4 }
   0xe   :  { %p123_p7 = pnand %p122_p6, %p116_p3 }
  0x10   :  { %126 = shalt.err (!%p123_p7)  }
  0x11   :  { %s154_s26 = smov [#allocation4]  }
  0x12   :  { %13 = dma.vmem_to_smem %s11_s24, 16, %s154_s26, [#allocation2] }
  0x13   :  { %149 = dma.done.wait [#allocation2], 32 }
  0x14   :  { %150 = vsyncadd [#allocation2], 4294967264 }
  0x15   :  { %15 = sfence }
  0x16   :  { %s20_s27 = sld [smem:[#allocation3]]  ;;  %s94_s28 = sld [smem:[#allocation3 + $0x2]] }
  0x17   :  { %s95_s0 = sld [smem:[#allocation3 + $0x4]]  ;;  %s96_s29 = sld [smem:[#allocation3 + $0x6]] }
  0x18   :  { %s97_s30 = sld [smem:[#allocation3 + $0x1]] }
  0x19   :  { %16 = vsyncpa [#allocation6], 0  ;;  %s98_s1 = sld [smem:[#allocation3 + $0x3]]  ;;  %s99_s4 = sld [smem:[#allocation3 + $0x5]]  ;;  %v19_v0 = vld [vmem:[%s207_s2] sm:$0xf] }
  0x1a   :  { %s100_s5 = sld [smem:[#allocation3 + $0x7]]  ;;  %s44_s8 = sld [smem:[#allocation4]]  ;;  %vm77_vm0 = vcmask 1040384  }
  0x1b   :  { %s101_s9 = sld [smem:[#allocation4 + $0x1]]  ;;  %s155_s2 = smov [#allocation5]  }
  0x1c   :  { %v21_v1 = vstv %s20_s27  ;;  %v24_v2 = vstv %s94_s28  ;;  %s86_s10 = sshll.u32 %s155_s2, 4  ;;  %s87_s10 = int_to_ptr.vmem [resolvable:$true] %s86_s10 }
  0x1d   :  { %v22_v3 = vmul.f32 %v21_v1, %v19_v0  ;;  %v25_v4 = vmul.f32 %v24_v2, %v19_v0  ;;  %v31_v5 = vstv %s95_s0  ;;  %v38_v6 = vstv %s96_s29  ;;  %s127_s11 = scalar_lea.vmem %s87_s10, 32  ;;  %p132_p9 = scmp.lt.s32.totalorder %s87_s10, %s87_s10 }
  0x1e   :  { %v32_v7 = vmul.f32 %v31_v5, %v19_v0  ;;  %v39_v8 = vmul.f32 %v38_v6, %v19_v0  ;;  %v48_v9 = vstv %s97_s30  ;;  %p128_p8 = scmp.ne.s32.totalorder %s87_s10, %s127_s11  ;;  %p133_p10 = scmp.lt.s32.totalorder %s127_s11, %s127_s11 }
  0x1f   :  { %v27_v10 = vrot.slane %v25_v4, 1  ;;  %v51_v11 = vstv %s98_s1  ;;  %v58_v12 = vstv %s99_s4  ;;  %v49_v14 = vmul.f32 %v48_v9, %v19_v0 }
  0x20   :  { %v34_v13 = vrot.slane %v32_v7, 2  ;;  %v52_v15 = vmul.f32 %v51_v11, %v19_v0  ;;  %v59_v16 = vmul.f32 %v58_v12, %v19_v0  ;;  %v65_v18 = vstv %s100_s5  ;;  %p134_p11 = por %p133_p10, %p132_p9 }
  0x21   :  { %v29_v17 = vadd.f32 %v27_v10, %v22_v3  ;;  %v41_v19 = vrot.slane %v39_v8, 3  ;;  %v66_v22 = vmul.f32 %v65_v18, %v19_v0  ;;  %v45_v28 = vstv %s44_s8 }
  0x22   :  { %v54_v20 = vrot.slane %v52_v15, 1  ;;  %v61_v21 = vrot.slane %v59_v16, 2  ;;  %v72_v29 = vstv %s101_s9  ;;  %p135_p12 = pnand %p134_p11, %p128_p8 }
  0x23   :  { %v36_v23 = vadd.f32 %v34_v13, %v29_v17  ;;  %v68_v25 = vrot.slane %v66_v22, 3 }
  0x24   :  { %v56_v24 = vadd.f32 %v54_v20, %v49_v14 }
  0x25   :  { %v43_v26 = vadd.f32 %v41_v19, %v36_v23 }
  0x26   :  { %v63_v27 = vadd.f32 %v61_v21, %v56_v24 }
  0x27   :  { %v46_v31 = vadd.f32 %v45_v28, %v43_v26 }
  0x28   :  { %v70_v30 = vadd.f32 %v68_v25, %v63_v27 }
  0x2a   :  { %v73_v32 = vadd.f32 %v72_v29, %v70_v30 }
  0x2c   :  { %v75_v33 = vrot.slane %v73_v32, 7 }
  0x2e   :  { %v78_v34 = vsel %vm77_vm0, %v46_v31, %v75_v33 }
  0x2f   :  { %79 = vst [vmem:[#allocation5] sm:$0x3] %v78_v34 }
  0x30   :  { %138 = shalt.err (!%p135_p12)
}
  0x31   :  { %s139_s14 = scalar_lea.hbm %s208_s3, 32 }
  0x32   :  { %p140_p13 = scmp.ne.s32.totalorder %s208_s3, %s139_s14  ;;  %p143_p0 = scmp.lt.u32.totalorder %s139_s14, %s208_s3 }
  0x34   :  { %p145_p1 = pnand %p143_p0, %p140_p13 }
  0x36   :  { %148 = shalt.err (!%p145_p1)
}
  0x37   :  { %89 = dma.vmem_to_hbm [thread:$0]  %s87_s10, 32, %s208_s3, [#allocation6]  }
  0x38   :  { %151 = dma.done.wait [#allocation6], 32  }
  0x39   :  { %152 = vsyncadd [#allocation6], 4294967264 }
  0x3a   :  { %93 = vsyncpa [#allocation6], 1 }

</bundles_post_ra>
